<compile_context>
chip_gen: v5e
topology: v5e:2x2
jax: 0.10.0
libtpu: 0.0.40
codegen_flags: <defaults>
</compile_context>

<pallas_src>
import jax
import jax.numpy as jnp
from jax.experimental import pallas as pl
from jax.experimental.pallas import tpu as pltpu


def _round_up(a, b):
    return ((a + b - 1) // b) * b


def _choose_row_tile(n_rows, width, itemsize):
    """Row tile: large enough to approach the HBM roofline, small enough that
    double-buffered in/out blocks (with f32 temps) stay well inside the v7x
    32 MiB default-scoped VMEM budget."""
    sub = 8 if itemsize >= 4 else 16
    budget_bytes = 2 * 1024 * 1024            # per f32 input block
    t = max(sub, budget_bytes // max(1, width * 4))
    t = min(t, 1024)
    t = (t // sub) * sub
    return min(t, _round_up(n_rows, sub))


def _stats_kernel(x_ref, colsum_ref, sqsum_ref):
    # Output blocks map to the same (0, 0) tile for every grid step -> they
    # stay resident in VMEM and act as accumulators across the row tiles.
    @pl.when(pl.program_id(0) == 0)
    def _():
        colsum_ref[...] = jnp.zeros_like(colsum_ref)
        sqsum_ref[...] = jnp.zeros_like(sqsum_ref)

    x = x_ref[...].astype(jnp.float32)                     # per-tile upcast
    colsum_ref[...] += jnp.sum(x, axis=0, keepdims=True)   # [1, D]
    sqsum_ref[...] += jnp.sum(x * x)                       # scalar -> (1,1)


def _normalize_kernel(x_ref, cm_ref, s_ref, o_ref):
    x = x_ref[...].astype(jnp.float32)
    s = s_ref[0, 0]                                        # SMEM scalar
    o_ref[...] = ((x - cm_ref[...]) * s).astype(o_ref.dtype)


def _normalize_call(x2, cm, s_arr, tile_rows, width, out_dtype, itemsize):
    rows = x2.shape[0]
    return pl.pallas_call(
        _normalize_kernel,
        out_shape=jax.ShapeDtypeStruct((rows, width), out_dtype),
        grid=(rows // tile_rows,),
        in_specs=[
            pl.BlockSpec((tile_rows, width), lambda i: (i, 0)),
            pl.BlockSpec((1, width), lambda i: (0, 0)),
            pl.BlockSpec(memory_space=pltpu.MemorySpace.SMEM),
        ],
        out_specs=pl.BlockSpec((tile_rows, width), lambda i: (i, 0)),
        compiler_params=pltpu.CompilerParams(
            dimension_semantics=("parallel",)),      # megacore on v7x
        cost_estimate=pl.CostEstimate(
            flops=2 * rows * width,
            transcendentals=0,
            bytes_accessed=rows * width * 2 * itemsize + 4 * width + 4),
    )(x2, cm, s_arr)


def pairnorm(x, mode="PN", scale=1.0):
    """PairNorm forward. x: [N, D] (nodes x features)."""
    assert mode in ["None", "PN"]
    if mode == "None":
        return x

    n, d = x.shape
    out_dtype = x.dtype
    itemsize = x.dtype.itemsize

    # ---------------- Pass 1: global stats (single read of x) --------------
    nt = _choose_row_tile(n, d, itemsize)
    n_pad = _round_up(n, nt)
    xp = jnp.pad(x, ((0, n_pad - n), (0, 0))) if n_pad != n else x

    col_sum, sq_sum = pl.pallas_call(
        _stats_kernel,
        out_shape=(
            jax.ShapeDtypeStruct((1, d), jnp.float32),
            jax.ShapeDtypeStruct((1, 1), jnp.float32),
        ),
        grid=(n_pad // nt,),
        in_specs=[pl.BlockSpec((nt, d), lambda i: (i, 0))],
        out_specs=(
            pl.BlockSpec((1, d), lambda i: (0, 0)),
            pl.BlockSpec((1, 1), lambda i: (0, 0)),
        ),
        compiler_params=pltpu.CompilerParams(
            dimension_semantics=("arbitrary",)),     # reduction axis
        cost_estimate=pl.CostEstimate(
            flops=3 * n_pad * d,
            transcendentals=0,
            bytes_accessed=n_pad * d * itemsize + 4 * d + 4),
    )(xp)

    # Tiny scalar epilogue (O(D) work) in plain JAX.  Fold scale and the
    # 1/rownorm_mean into a single scalar multiplier s.
    n_f = jnp.float32(n)
    col_mean = col_sum / n_f                                    # (1, D) f32
    mean_sq = (sq_sum[0, 0] - n_f * jnp.sum(col_mean * col_mean)) / n_f
    mean_sq = jnp.maximum(mean_sq, 0.0)
    s = jnp.float32(scale) * jax.lax.rsqrt(jnp.float32(1e-6) + mean_sq)
    s_arr = jnp.reshape(s, (1, 1)).astype(jnp.float32)

    # -------------- Pass 2: normalize (read x, write out) ------------------
    if d % 128 != 0 and 128 % d == 0:
        # Lane-dense path: present a (rows, 128) slab so the output stores are
        # full-width vst instead of masked partial stores.  The wrapper-side
        # reshape is a free (contiguous) relayout.
        reps = 128 // d
        m = -(-n // reps)
        mt = _choose_row_tile(m, 128, itemsize)
        m_pad = _round_up(m, mt)
        n_pad2 = m_pad * reps
        x2 = jnp.pad(x, ((0, n_pad2 - n), (0, 0))) if n_pad2 != n else x
        x2 = x2.reshape(m_pad, 128)
        cm2 = jnp.tile(col_mean, (1, reps))                    # (1, 128)
        out2 = _normalize_call(x2, cm2, s_arr, mt, 128, out_dtype, itemsize)
        out = out2.reshape(n_pad2, d)[:n]
    else:
        nt2 = _choose_row_tile(n, d, itemsize)
        n_pad2 = _round_up(n, nt2)
        x2 = jnp.pad(x, ((0, n_pad2 - n), (0, 0))) if n_pad2 != n else x
        out = _normalize_call(x2, col_mean, s_arr, nt2, d, out_dtype,
                              itemsize)[:n]
    return out


def _pairnorm_ref(x, mode="PN", scale=1.0):
    # Pure-JAX reference mirroring the PyTorch forward.
    if mode == "None":
        return x
    col_mean = x.mean(axis=0)
    xc = x - col_mean
    rownorm_mean = jnp.sqrt(1e-6 + (xc ** 2).sum(axis=1).mean())
    return scale * xc / rownorm_mean


if __name__ == "__main__":
    key = jax.random.PRNGKey(0)

    # Main case (matches the module's typical [N, D] node-feature layout).
    N, D = 8, 32
    x = jax.random.normal(key, (N, D), dtype=jnp.float32)
    out = jax.block_until_ready(pairnorm(x, mode="PN", scale=1.0))
    ref = _pairnorm_ref(x, mode="PN", scale=1.0)
    assert out.shape == (N, D) and out.dtype == x.dtype
    assert jnp.allclose(out, ref, atol=1e-5, rtol=1e-5)

    # Second case: exercises the non-reshape (D multiple of 128) path and
    # row padding / slicing.
    N2, D2 = 20, 128
    x2 = jax.random.normal(jax.random.PRNGKey(1), (N2, D2), dtype=jnp.float32)
    out2 = jax.block_until_ready(pairnorm(x2, mode="PN", scale=1.0))
    ref2 = _pairnorm_ref(x2, mode="PN", scale=1.0)
    assert out2.shape == (N2, D2)
    assert jnp.allclose(out2, ref2, atol=1e-5, rtol=1e-5)

    print("KERNEL_OK")
</pallas_src>

<mosaic_0001>
module attributes {stable_mosaic.version = 11 : i64} {
  func.func @_stats_kernel(%arg0: i32, %arg1: memref<8x32xf32, #tpu.memory_space<vmem>>, %arg2: memref<1x32xf32, #tpu.memory_space<vmem>>, %arg3: memref<1x1xf32, #tpu.memory_space<vmem>>) attributes {dimension_semantics = [#tpu.dimension_semantics<arbitrary>], iteration_bounds = array<i64: 1>, scalar_prefetch = 0 : i64, scratch_operands = 0 : i64, tpu.core_type = #tpu.core_type<tc>, window_params = [{transform_indices = @transform_0, window_bounds = array<i64: 8, 32>}, {pipeline_mode = #tpu.pipeline_mode<synchronous>, transform_indices = @transform_1, window_bounds = array<i64: 1, 32>}, {pipeline_mode = #tpu.pipeline_mode<synchronous>, transform_indices = @transform_2, window_bounds = array<i64: 1, 1>}]} {
    %c0_i32 = arith.constant 0 : i32
    %0 = arith.cmpi eq, %arg0, %c0_i32 : i32
    %1 = arith.extui %0 : i1 to i32
    %c0_i32_0 = arith.constant 0 : i32
    %2 = arith.cmpi ne, %1, %c0_i32_0 : i32
    scf.if %2 {
      %cst_11 = arith.constant 0.000000e+00 : f32
      %18 = vector.broadcast %cst_11 : f32 to vector<1x32xf32>
      %c0_12 = arith.constant 0 : index
      %c0_13 = arith.constant 0 : index
      %19 = vector.load %arg2[%c0_12, %c0_13] : memref<1x32xf32, #tpu.memory_space<vmem>>, vector<1x32xf32>
      tpu.vector_store %arg2[%c0_12, %c0_13], %18 {strides = array<i32>} : memref<1x32xf32, #tpu.memory_space<vmem>>, vector<1x32xf32>,
      %cst_14 = arith.constant 0.000000e+00 : f32
      %20 = vector.broadcast %cst_14 : f32 to vector<1x1xf32>
      %c0_15 = arith.constant 0 : index
      %c0_16 = arith.constant 0 : index
      %21 = vector.load %arg3[%c0_15, %c0_16] : memref<1x1xf32, #tpu.memory_space<vmem>>, vector<1x1xf32>
      tpu.vector_store %arg3[%c0_15, %c0_16], %20 {strides = array<i32>} : memref<1x1xf32, #tpu.memory_space<vmem>>, vector<1x1xf32>,
    } else {
    }
    %c0 = arith.constant 0 : index
    %c0_1 = arith.constant 0 : index
    %3 = vector.load %arg1[%c0, %c0_1] : memref<8x32xf32, #tpu.memory_space<vmem>>, vector<8x32xf32>
    %c0_2 = arith.constant 0 : index
    %c0_3 = arith.constant 0 : index
    %4 = vector.load %arg2[%c0_2, %c0_3] : memref<1x32xf32, #tpu.memory_space<vmem>>, vector<1x32xf32>
    %cst = arith.constant dense<0.000000e+00> : vector<32xf32>
    %5 = vector.multi_reduction <add>, %3, %cst [0] : vector<8x32xf32> to vector<32xf32>
    %6 = vector.shape_cast %5 : vector<32xf32> to vector<1x32xf32>
    %7 = arith.addf %4, %6 : vector<1x32xf32>
    %c0_4 = arith.constant 0 : index
    %c0_5 = arith.constant 0 : index
    %8 = vector.load %arg2[%c0_4, %c0_5] : memref<1x32xf32, #tpu.memory_space<vmem>>, vector<1x32xf32>
    tpu.vector_store %arg2[%c0_4, %c0_5], %7 {strides = array<i32>} : memref<1x32xf32, #tpu.memory_space<vmem>>, vector<1x32xf32>,
    %c0_6 = arith.constant 0 : index
    %c0_7 = arith.constant 0 : index
    %9 = vector.load %arg3[%c0_6, %c0_7] : memref<1x1xf32, #tpu.memory_space<vmem>>, vector<1x1xf32>
    %10 = arith.mulf %3, %3 : vector<8x32xf32>
    %11 = vector.shape_cast %10 : vector<8x32xf32> to vector<1x8x32xf32>
    %cst_8 = arith.constant dense<0.000000e+00> : vector<1xf32>
    %12 = vector.multi_reduction <add>, %11, %cst_8 [1, 2] : vector<1x8x32xf32> to vector<1xf32>
    %13 = vector.shape_cast %12 : vector<1xf32> to vector<1x1x1xf32>
    %14 = vector.extract %13[0, 0, 0] : f32 from vector<1x1x1xf32>
    %15 = vector.broadcast %14 : f32 to vector<1x1xf32>
    %16 = arith.addf %9, %15 : vector<1x1xf32>
    %c0_9 = arith.constant 0 : index
    %c0_10 = arith.constant 0 : index
    %17 = vector.load %arg3[%c0_9, %c0_10] : memref<1x1xf32, #tpu.memory_space<vmem>>, vector<1x1xf32>
    tpu.vector_store %arg3[%c0_9, %c0_10], %16 {strides = array<i32>} : memref<1x1xf32, #tpu.memory_space<vmem>>, vector<1x1xf32>,
    return
  }
  func.func @transform_0(%arg0: i32) -> (i32, i32) {
    %c0_i32 = arith.constant 0 : i32
    %c0_i32_0 = arith.constant 0 : i32
    return %arg0, %c0_i32 : i32, i32
  }
  func.func @transform_1(%arg0: i32) -> (i32, i32) {
    %c0_i32 = arith.constant 0 : i32
    %c0_i32_0 = arith.constant 0 : i32
    %c0_i32_1 = arith.constant 0 : i32
    return %c0_i32, %c0_i32_0 : i32, i32
  }
  func.func @transform_2(%arg0: i32) -> (i32, i32) {
    %c0_i32 = arith.constant 0 : i32
    %c0_i32_0 = arith.constant 0 : i32
    %c0_i32_1 = arith.constant 0 : i32
    return %c0_i32, %c0_i32_0 : i32, i32
  }
}

</mosaic_0001>

<bundles_post_ra>
// kernel: tpu_custom_call.1
= control target key start
LH: loop header
LB: loop body
LE: loop exit
PB: predicated region body
PF: predicated region fallthrough
CT: control target
= control target key end

     0   :  { %8 = vsyncpa [#allocation3], 0  ;;  %s212_s0 = inlined_call_operand.hbm [shape: f32[8,32], index: 0, kind: input, shape index: {}]   ;;  %s213_s1 = inlined_call_operand.hbm [shape: f32[1,32], index: 1, kind: output, shape index: {0}]   ;;  %s214_s2 = inlined_call_operand.hbm [shape: f32[1,1], index: 2, kind: output, shape index: {1}]  }
   0x1   :  { %9 = vsyncpa [#allocation4], 0 }
   0x2   :  { %10 = vsyncpa [#allocation7], 0  ;;  %s16_s11 = sshll.u32 %s212_s0, 4  ;;  %s180_s12 = smov [#allocation2]   ;;  %s17_s11 = int_to_ptr.hbm [resolvable:$true] %s16_s11 }
   0x3   :  { %s18_s13 = sshll.u32 %s180_s12, 4  ;;  %s19_s13 = int_to_ptr.vmem [resolvable:$true] %s18_s13 }
   0x4   :  { %21 = dma.hbm_to_vmem [thread:$0]  %s17_s11, 128, %s19_s13, [#allocation3]  }
   0x5   :  { %174 = dma.done.wait [#allocation3], 128  }
   0x6   :  { %175 = vsyncadd [#allocation3], 4294967168  ;;  %vm30_vm0 = vcmask 253952   ;;  %vm32_vm1 = vcmask 0   ;;  %v181_v0 = vmov 0.0   ;;  %v34_v1 = vld [vmem:[#allocation2] sm:$0xff] }
   0x7   :  { %31 = vst.msk [vmem:[#allocation5] sm:$0x1] %vm30_vm0, %v181_v0  ;;  %vm36_vm2 = vcmask 261120   ;;  %v48_v3 = vmul.f32 %v34_v1, %v34_v1  ;;  %s182_s0 = smov [#allocation5]   ;;  %s70_s17 = sshll.u32 %s213_s1, 4  ;;  %s71_s17 = int_to_ptr.hbm [resolvable:$true] %s70_s17 }
   0x8   :  { %33 = vst.msk [vmem:[#allocation6] sm:$0x1] %vm32_vm1, %v181_v0  ;;  %v37_v2 = vsel %vm36_vm2, %v34_v1, 0.0  ;;  %s68_s14 = sshll.u32 %s182_s0, 4  ;;  %s183_s18 = smov [#allocation6]   ;;  %s69_s14 = int_to_ptr.vmem [resolvable:$true] %s68_s14 }
   0x9   :  { %v38_v4 = vrot.slane %v37_v2, 4  ;;  %v49_v5 = vsel %vm36_vm2, %v48_v3, 0.0  ;;  %s79_s19 = sshll.u32 %s183_s18, 4  ;;  %s81_s22 = sshll.u32 %s214_s2, 4  ;;  %s80_s19 = int_to_ptr.vmem [resolvable:$true] %s79_s19  ;;  %s82_s22 = int_to_ptr.hbm [resolvable:$true] %s81_s22 }
   0xa   :  { %50 = vadd.xlane.f32.xlu0 %v49_v5 }
   0xb   :  { %v39_v6 = vadd.f32 %v38_v4, %v37_v2 }
   0xd   :  { %v40_v7 = vrot.slane %v39_v6, 2 }
   0xe   :  { %v35_v10 = vld [vmem:[#allocation5] sm:$0x1] }
   0xf   :  { %v41_v8 = vadd.f32 %v40_v7, %v39_v6  ;;  %v47_v20 = vld [vmem:[#allocation6] sm:$0x1] }
  0x11   :  { %v42_v9 = vrot.slane %v41_v8, 1 }
  0x13   :  { %v43_v11 = vadd.f32 %v42_v9, %v41_v8 }
  0x15   :  { %v44_v12 = vadd.f32 %v43_v11, %v35_v10 }
  0x17   :  { %46 = vst.msk [vmem:[#allocation5] sm:$0x1] %vm30_vm0, %v44_v12 }
  0x18   :  { %73 = dma.vmem_to_hbm [thread:$0]  %s69_s14, 16, %s71_s17, [#allocation4]  }
  0x7d   :  { %v51_v13 = vpop.xlane.xlu0 %50 }
  0x7e   :  { %v52_v14 = vrot.slane %v51_v13, 4 }
  0x80   :  { %v53_v15 = vadd.f32 %v52_v14, %v51_v13 }
  0x82   :  { %v54_v16 = vrot.slane %v53_v15, 2 }
  0x84   :  { %v55_v17 = vadd.f32 %v54_v16, %v53_v15 }
  0x86   :  { %v56_v18 = vrot.slane %v55_v17, 1 }
  0x88   :  { %v57_v19 = vadd.f32 %v56_v18, %v55_v17 }
  0x8a   :  { %96 = vpush %v57_v19 }
  0xbb   :  { %s97_s23 = spop %96 }
  0xbc   :  { %v59_v21 = vstv %s97_s23 }
  0xbd   :  { %v60_v22 = vadd.f32 %v59_v21, %v47_v20 }
  0xbf   :  { %62 = vst.msk [vmem:[#allocation6] sm:$0x1] %vm32_vm1, %v60_v22 }
  0xc0   :  { %84 = dma.vmem_to_hbm [thread:$0]  %s80_s19, 16, %s82_s22, [#allocation7]  }
  0xc1   :  { %176 = dma.done.wait [#allocation4], 16  }
  0xc2   :  { %177 = vsyncadd [#allocation4], 4294967280 }
  0xc3   :  { %178 = dma.done.wait [#allocation7], 16  }
  0xc4   :  { %179 = vsyncadd [#allocation7], 4294967280 }
  0xc5   :  { %93 = vsyncpa [#allocation3], 1 }
  0xc6   :  { %94 = vsyncpa [#allocation4], 1 }
  0xc7   :  { %95 = vsyncpa [#allocation7], 1 }

</bundles_post_ra>
